<compile_context>
chip_gen: v5e
topology: v5e:2x2
jax: 0.10.0
libtpu: 0.0.40
codegen_flags: <defaults>
</compile_context>

<pallas_src>
import functools

import jax
import jax.numpy as jnp
from jax.experimental import pallas as pl
from jax.experimental.pallas import tpu as pltpu


def _ce_label_smooth_kernel(
    pred_ref,    # (TB, TC) float block of logits
    tgt_ref,     # (TB, 1) int32 target class indices
    out_ref,     # (TB, 1) float32 per-row loss (written at last class tile)
    m_ref,       # (TB, 1) f32 scratch: running row max
    l_ref,       # (TB, 1) f32 scratch: running sum(exp(x - m))
    sx_ref,      # (TB, 1) f32 scratch: running sum_c x
    st_ref,      # (TB, 1) f32 scratch: running x[target]
    *,
    epsilon,
    num_classes,
    batch,
):
    i = pl.program_id(0)          # batch tile
    k = pl.program_id(1)          # class tile (innermost, reduction axis)
    tb, tc = pred_ref.shape

    @pl.when(k == 0)
    def _():
        m_ref[...] = jnp.full_like(m_ref, -jnp.inf)
        l_ref[...] = jnp.zeros_like(l_ref)
        sx_ref[...] = jnp.zeros_like(sx_ref)
        st_ref[...] = jnp.zeros_like(st_ref)

    x = pred_ref[...].astype(jnp.float32)                              # (TB, TC)

    # Global class index of each lane in this tile; mask padded classes.
    cls = jax.lax.broadcasted_iota(jnp.int32, (tb, tc), 1) + k * tc
    valid_c = cls < num_classes
    xm = jnp.where(valid_c, x, -jnp.inf)   # for max / exp
    x0 = jnp.where(valid_c, x, 0.0)        # for plain sum

    # Online log-sum-exp update (flash-softmax style).
    m_prev = m_ref[...]
    m_new = jnp.maximum(m_prev, jnp.max(xm, axis=1, keepdims=True))
    alpha = jnp.exp(m_prev - m_new)        # 0 on the first tile (m_prev = -inf)
    l_ref[...] = alpha * l_ref[...] + jnp.sum(jnp.exp(xm - m_new), axis=1, keepdims=True)
    m_ref[...] = m_new

    # Running plain sum of logits and masked pick of x[target] (no one-hot).
    sx_ref[...] = sx_ref[...] + jnp.sum(x0, axis=1, keepdims=True)
    st_ref[...] = st_ref[...] + jnp.sum(
        jnp.where(cls == tgt_ref[...], x, 0.0), axis=1, keepdims=True
    )

    @pl.when(k == pl.num_programs(1) - 1)
    def _():
        lse = m_ref[...] + jnp.log(l_ref[...])                          # (TB, 1)
        per_row = (
            lse
            - (1.0 - epsilon) * st_ref[...]
            - (epsilon / num_classes) * sx_ref[...]
        )
        # Zero out rows that fall past the true batch size (edge batch tile).
        row = jax.lax.broadcasted_iota(jnp.int32, (tb, 1), 0) + i * tb
        out_ref[...] = jnp.where(row < batch, per_row, 0.0)


def cross_entropy_with_label_smooth(
    predicts, targets, *, num_classes, epsilon=0.1, block_b=256, block_c=2048
):
    """predicts: (B, num_classes) float (f32/bf16); targets: (B,) int class ids.

    block_b must be a multiple of 8 (used only when B > block_b);
    block_c must be a multiple of 128 (used only when C > block_c).
    """
    B, C = predicts.shape
    assert C == num_classes
    targets_col = targets.reshape(B, 1).astype(jnp.int32)

    tb = block_b if B > block_b else B
    tc = block_c if C > block_c else C
    n_b = pl.cdiv(B, tb)
    n_c = pl.cdiv(C, tc)

    kernel = functools.partial(
        _ce_label_smooth_kernel,
        epsilon=float(epsilon),
        num_classes=int(num_classes),
        batch=int(B),
    )

    bytes_accessed = (
        predicts.size * predicts.dtype.itemsize + targets_col.size * 4 + B * 4
    )
    cost = pl.CostEstimate(
        flops=6 * B * C, transcendentals=B * C, bytes_accessed=bytes_accessed
    )

    per_row = pl.pallas_call(
        kernel,
        out_shape=jax.ShapeDtypeStruct((B, 1), jnp.float32),
        grid_spec=pltpu.PrefetchScalarGridSpec(
            num_scalar_prefetch=0,
            grid=(n_b, n_c),
            in_specs=[
                pl.BlockSpec((tb, tc), lambda i, k: (i, k)),
                pl.BlockSpec((tb, 1), lambda i, k: (i, 0)),
            ],
            out_specs=pl.BlockSpec((tb, 1), lambda i, k: (i, 0)),
            scratch_shapes=[pltpu.VMEM((tb, 1), jnp.float32)] * 4,
        ),
        compiler_params=pltpu.CompilerParams(
            dimension_semantics=("parallel", "arbitrary"),
            vmem_limit_bytes=32 * 1024 * 1024,
        ),
        cost_estimate=cost,
    )(predicts, targets_col)

    # loss = (-targets_smoothed * log_probs).mean(0).sum() == sum(per_row) / B
    return jnp.sum(per_row) / jnp.float32(B)


def _reference(predicts, targets, *, num_classes, epsilon):
    x = predicts.astype(jnp.float32)
    log_probs = jax.nn.log_softmax(x, axis=1)
    onehot = jax.nn.one_hot(targets, num_classes, dtype=jnp.float32)
    smoothed = (1.0 - epsilon) * onehot + epsilon / num_classes
    return jnp.sum(jnp.mean(-smoothed * log_probs, axis=0))


if __name__ == "__main__":
    key = jax.random.PRNGKey(0)
    epsilon = 0.1  # stands in for cfg.LOSS.LABEL_SMOOTH_EPSILON

    # Case 1: small shapes (single batch / class tile).
    batch, num_classes = 8, 32
    kp, kt = jax.random.split(key)
    predicts = jax.random.normal(kp, (batch, num_classes), dtype=jnp.float32)
    targets = jax.random.randint(kt, (batch,), 0, num_classes, dtype=jnp.int32)

    loss = cross_entropy_with_label_smooth(
        predicts, targets, num_classes=num_classes, epsilon=epsilon
    )
    loss = jax.block_until_ready(loss)
    ref = _reference(predicts, targets, num_classes=num_classes, epsilon=epsilon)
    assert jnp.allclose(loss, ref, atol=1e-5, rtol=1e-5), (loss, ref)

    # Case 2: exercises batch + class tiling, ragged edges, online LSE path.
    batch2, num_classes2 = 12, 200
    kp2, kt2 = jax.random.split(kt)
    predicts2 = jax.random.normal(kp2, (batch2, num_classes2), dtype=jnp.float32)
    targets2 = jax.random.randint(kt2, (batch2,), 0, num_classes2, dtype=jnp.int32)

    loss2 = cross_entropy_with_label_smooth(
        predicts2,
        targets2,
        num_classes=num_classes2,
        epsilon=epsilon,
        block_b=8,
        block_c=128,
    )
    loss2 = jax.block_until_ready(loss2)
    ref2 = _reference(predicts2, targets2, num_classes=num_classes2, epsilon=epsilon)
    assert jnp.allclose(loss2, ref2, atol=1e-4, rtol=1e-4), (loss2, ref2)

    print("KERNEL_OK")
</pallas_src>

<mosaic_0001>
module attributes {stable_mosaic.version = 11 : i64} {
  func.func @_ce_label_smooth_kernel(%arg0: i32, %arg1: i32, %arg2: memref<8x32xf32, #tpu.memory_space<vmem>>, %arg3: memref<8x1xi32, #tpu.memory_space<vmem>>, %arg4: memref<8x1xf32, #tpu.memory_space<vmem>>, %arg5: memref<8x1xf32, #tpu.memory_space<vmem>>, %arg6: memref<8x1xf32, #tpu.memory_space<vmem>>, %arg7: memref<8x1xf32, #tpu.memory_space<vmem>>, %arg8: memref<8x1xf32, #tpu.memory_space<vmem>>) attributes {dimension_semantics = [#tpu.dimension_semantics<parallel>, #tpu.dimension_semantics<arbitrary>], iteration_bounds = array<i64: 1, 1>, scalar_prefetch = 0 : i64, scratch_operands = 4 : i64, tpu.core_type = #tpu.core_type<tc>, window_params = [{transform_indices = @transform_0, window_bounds = array<i64: 8, 32>}, {transform_indices = @transform_1, window_bounds = array<i64: 8, 1>}, {transform_indices = @transform_2, window_bounds = array<i64: 8, 1>}]} {
    %c0_i32 = arith.constant 0 : i32
    %0 = arith.cmpi eq, %arg1, %c0_i32 : i32
    %1 = arith.extui %0 : i1 to i32
    %c0_i32_0 = arith.constant 0 : i32
    %2 = arith.cmpi ne, %1, %c0_i32_0 : i32
    scf.if %2 {
      %cst_29 = arith.constant 0xFF800000 : f32
      %48 = vector.broadcast %cst_29 : f32 to vector<8x1xf32>
      %c0_30 = arith.constant 0 : index
      %c0_31 = arith.constant 0 : index
      %49 = vector.load %arg5[%c0_30, %c0_31] : memref<8x1xf32, #tpu.memory_space<vmem>>, vector<8x1xf32>
      tpu.vector_store %arg5[%c0_30, %c0_31], %48 {strides = array<i32>} : memref<8x1xf32, #tpu.memory_space<vmem>>, vector<8x1xf32>,
      %cst_32 = arith.constant 0.000000e+00 : f32
      %50 = vector.broadcast %cst_32 : f32 to vector<8x1xf32>
      %c0_33 = arith.constant 0 : index
      %c0_34 = arith.constant 0 : index
      %51 = vector.load %arg6[%c0_33, %c0_34] : memref<8x1xf32, #tpu.memory_space<vmem>>, vector<8x1xf32>
      tpu.vector_store %arg6[%c0_33, %c0_34], %50 {strides = array<i32>} : memref<8x1xf32, #tpu.memory_space<vmem>>, vector<8x1xf32>,
      %cst_35 = arith.constant 0.000000e+00 : f32
      %52 = vector.broadcast %cst_35 : f32 to vector<8x1xf32>
      %c0_36 = arith.constant 0 : index
      %c0_37 = arith.constant 0 : index
      %53 = vector.load %arg7[%c0_36, %c0_37] : memref<8x1xf32, #tpu.memory_space<vmem>>, vector<8x1xf32>
      tpu.vector_store %arg7[%c0_36, %c0_37], %52 {strides = array<i32>} : memref<8x1xf32, #tpu.memory_space<vmem>>, vector<8x1xf32>,
      %cst_38 = arith.constant 0.000000e+00 : f32
      %54 = vector.broadcast %cst_38 : f32 to vector<8x1xf32>
      %c0_39 = arith.constant 0 : index
      %c0_40 = arith.constant 0 : index
      %55 = vector.load %arg8[%c0_39, %c0_40] : memref<8x1xf32, #tpu.memory_space<vmem>>, vector<8x1xf32>
      tpu.vector_store %arg8[%c0_39, %c0_40], %54 {strides = array<i32>} : memref<8x1xf32, #tpu.memory_space<vmem>>, vector<8x1xf32>,
    } else {
    }
    %c0 = arith.constant 0 : index
    %c0_1 = arith.constant 0 : index
    %3 = vector.load %arg2[%c0, %c0_1] : memref<8x32xf32, #tpu.memory_space<vmem>>, vector<8x32xf32>
    %4 = tpu.iota {dimensions = array<i32: 1>} : vector<8x32xi32>
    %c32_i32 = arith.constant 32 : i32
    %5 = arith.muli %arg1, %c32_i32 : i32
    %6 = vector.broadcast %5 : i32 to vector<8x32xi32>
    %7 = arith.addi %4, %6 : vector<8x32xi32>
    %c32_i32_2 = arith.constant 32 : i32
    %8 = vector.broadcast %c32_i32_2 : i32 to vector<8x32xi32>
    %9 = arith.cmpi slt, %7, %8 : vector<8x32xi32>
    %cst = arith.constant 0xFF800000 : f32
    %10 = vector.broadcast %cst : f32 to vector<8x32xf32>
    %11 = arith.select %9, %3, %10 : vector<8x32xi1>, vector<8x32xf32>
    %cst_3 = arith.constant 0.000000e+00 : f32
    %12 = vector.broadcast %cst_3 : f32 to vector<8x32xf32>
    %13 = arith.select %9, %3, %12 : vector<8x32xi1>, vector<8x32xf32>
    %c0_4 = arith.constant 0 : index
    %c0_5 = arith.constant 0 : index
    %14 = vector.load %arg5[%c0_4, %c0_5] : memref<8x1xf32, #tpu.memory_space<vmem>>, vector<8x1xf32>
    %cst_6 = arith.constant dense<0xFF800000> : vector<8xf32>
    %15 = vector.multi_reduction <maximumf>, %11, %cst_6 [1] : vector<8x32xf32> to vector<8xf32>
    %16 = vector.shape_cast %15 : vector<8xf32> to vector<8x1xf32>
    %17 = arith.maximumf %14, %16 : vector<8x1xf32>
    %18 = arith.subf %14, %17 : vector<8x1xf32>
    %19 = math.exp %18 : vector<8x1xf32>
    %c0_7 = arith.constant 0 : index
    %c0_8 = arith.constant 0 : index
    %20 = vector.load %arg6[%c0_7, %c0_8] : memref<8x1xf32, #tpu.memory_space<vmem>>, vector<8x1xf32>
    %21 = arith.mulf %19, %20 : vector<8x1xf32>
    %22 = vector.broadcast %17 : vector<8x1xf32> to vector<8x32xf32>
    %23 = arith.subf %11, %22 : vector<8x32xf32>
    %24 = math.exp %23 : vector<8x32xf32>
    %cst_9 = arith.constant dense<0.000000e+00> : vector<8xf32>
    %25 = vector.multi_reduction <add>, %24, %cst_9 [1] : vector<8x32xf32> to vector<8xf32>
    %26 = vector.shape_cast %25 : vector<8xf32> to vector<8x1xf32>
    %27 = arith.addf %21, %26 : vector<8x1xf32>
    %c0_10 = arith.constant 0 : index
    %c0_11 = arith.constant 0 : index
    %28 = vector.load %arg6[%c0_10, %c0_11] : memref<8x1xf32, #tpu.memory_space<vmem>>, vector<8x1xf32>
    tpu.vector_store %arg6[%c0_10, %c0_11], %27 {strides = array<i32>} : memref<8x1xf32, #tpu.memory_space<vmem>>, vector<8x1xf32>,
    %c0_12 = arith.constant 0 : index
    %c0_13 = arith.constant 0 : index
    %29 = vector.load %arg5[%c0_12, %c0_13] : memref<8x1xf32, #tpu.memory_space<vmem>>, vector<8x1xf32>
    tpu.vector_store %arg5[%c0_12, %c0_13], %17 {strides = array<i32>} : memref<8x1xf32, #tpu.memory_space<vmem>>, vector<8x1xf32>,
    %c0_14 = arith.constant 0 : index
    %c0_15 = arith.constant 0 : index
    %30 = vector.load %arg7[%c0_14, %c0_15] : memref<8x1xf32, #tpu.memory_space<vmem>>, vector<8x1xf32>
    %cst_16 = arith.constant dense<0.000000e+00> : vector<8xf32>
    %31 = vector.multi_reduction <add>, %13, %cst_16 [1] : vector<8x32xf32> to vector<8xf32>
    %32 = vector.shape_cast %31 : vector<8xf32> to vector<8x1xf32>
    %33 = arith.addf %30, %32 : vector<8x1xf32>
    %c0_17 = arith.constant 0 : index
    %c0_18 = arith.constant 0 : index
    %34 = vector.load %arg7[%c0_17, %c0_18] : memref<8x1xf32, #tpu.memory_space<vmem>>, vector<8x1xf32>
    tpu.vector_store %arg7[%c0_17, %c0_18], %33 {strides = array<i32>} : memref<8x1xf32, #tpu.memory_space<vmem>>, vector<8x1xf32>,
    %c0_19 = arith.constant 0 : index
    %c0_20 = arith.constant 0 : index
    %35 = vector.load %arg8[%c0_19, %c0_20] : memref<8x1xf32, #tpu.memory_space<vmem>>, vector<8x1xf32>
    %c0_21 = arith.constant 0 : index
    %c0_22 = arith.constant 0 : index
    %36 = vector.load %arg3[%c0_21, %c0_22] : memref<8x1xi32, #tpu.memory_space<vmem>>, vector<8x1xi32>
    %37 = vector.broadcast %36 : vector<8x1xi32> to vector<8x32xi32>
    %38 = arith.cmpi eq, %7, %37 : vector<8x32xi32>
    %cst_23 = arith.constant 0.000000e+00 : f32
    %39 = vector.broadcast %cst_23 : f32 to vector<8x32xf32>
    %40 = arith.select %38, %3, %39 : vector<8x32xi1>, vector<8x32xf32>
    %cst_24 = arith.constant dense<0.000000e+00> : vector<8xf32>
    %41 = vector.multi_reduction <add>, %40, %cst_24 [1] : vector<8x32xf32> to vector<8xf32>
    %42 = vector.shape_cast %41 : vector<8xf32> to vector<8x1xf32>
    %43 = arith.addf %35, %42 : vector<8x1xf32>
    %c0_25 = arith.constant 0 : index
    %c0_26 = arith.constant 0 : index
    %44 = vector.load %arg8[%c0_25, %c0_26] : memref<8x1xf32, #tpu.memory_space<vmem>>, vector<8x1xf32>
    tpu.vector_store %arg8[%c0_25, %c0_26], %43 {strides = array<i32>} : memref<8x1xf32, #tpu.memory_space<vmem>>, vector<8x1xf32>,
    %c0_i32_27 = arith.constant 0 : i32
    %45 = arith.cmpi eq, %arg1, %c0_i32_27 : i32
    %46 = arith.extui %45 : i1 to i32
    %c0_i32_28 = arith.constant 0 : i32
    %47 = arith.cmpi ne, %46, %c0_i32_28 : i32
    scf.if %47 {
      %c0_29 = arith.constant 0 : index
      %c0_30 = arith.constant 0 : index
      %48 = vector.load %arg5[%c0_29, %c0_30] : memref<8x1xf32, #tpu.memory_space<vmem>>, vector<8x1xf32>
      %c0_31 = arith.constant 0 : index
      %c0_32 = arith.constant 0 : index
      %49 = vector.load %arg6[%c0_31, %c0_32] : memref<8x1xf32, #tpu.memory_space<vmem>>, vector<8x1xf32>
      %50 = math.log %49 : vector<8x1xf32>
      %51 = arith.addf %48, %50 : vector<8x1xf32>
      %c0_33 = arith.constant 0 : index
      %c0_34 = arith.constant 0 : index
      %52 = vector.load %arg8[%c0_33, %c0_34] : memref<8x1xf32, #tpu.memory_space<vmem>>, vector<8x1xf32>
      %cst_35 = arith.constant 0.899999976 : f32
      %53 = vector.broadcast %cst_35 : f32 to vector<8x1xf32>
      %54 = arith.mulf %53, %52 : vector<8x1xf32>
      %55 = arith.subf %51, %54 : vector<8x1xf32>
      %c0_36 = arith.constant 0 : index
      %c0_37 = arith.constant 0 : index
      %56 = vector.load %arg7[%c0_36, %c0_37] : memref<8x1xf32, #tpu.memory_space<vmem>>, vector<8x1xf32>
      %cst_38 = arith.constant 3.125000e-03 : f32
      %57 = vector.broadcast %cst_38 : f32 to vector<8x1xf32>
      %58 = arith.mulf %57, %56 : vector<8x1xf32>
      %59 = arith.subf %55, %58 : vector<8x1xf32>
      %60 = tpu.iota {dimensions = array<i32: 0>} : vector<8x1xi32>
      %c8_i32 = arith.constant 8 : i32
      %61 = arith.muli %arg0, %c8_i32 : i32
      %62 = vector.broadcast %61 : i32 to vector<8x1xi32>
      %63 = arith.addi %60, %62 : vector<8x1xi32>
      %c8_i32_39 = arith.constant 8 : i32
      %64 = vector.broadcast %c8_i32_39 : i32 to vector<8x1xi32>
      %65 = arith.cmpi slt, %63, %64 : vector<8x1xi32>
      %cst_40 = arith.constant 0.000000e+00 : f32
      %66 = vector.broadcast %cst_40 : f32 to vector<8x1xf32>
      %67 = arith.select %65, %59, %66 : vector<8x1xi1>, vector<8x1xf32>
      %c0_41 = arith.constant 0 : index
      %c0_42 = arith.constant 0 : index
      %68 = vector.load %arg4[%c0_41, %c0_42] : memref<8x1xf32, #tpu.memory_space<vmem>>, vector<8x1xf32>
      tpu.vector_store %arg4[%c0_41, %c0_42], %67 {strides = array<i32>} : memref<8x1xf32, #tpu.memory_space<vmem>>, vector<8x1xf32>,
    } else {
    }
    return
  }
  func.func @transform_0(%arg0: i32, %arg1: i32) -> (i32, i32) {
    %c0_i32 = arith.constant 0 : i32
    return %arg0, %arg1 : i32, i32
  }
  func.func @transform_1(%arg0: i32, %arg1: i32) -> (i32, i32) {
    %c0_i32 = arith.constant 0 : i32
    %c0_i32_0 = arith.constant 0 : i32
    return %arg0, %c0_i32 : i32, i32
  }
  func.func @transform_2(%arg0: i32, %arg1: i32) -> (i32, i32) {
    %c0_i32 = arith.constant 0 : i32
    %c0_i32_0 = arith.constant 0 : i32
    return %arg0, %c0_i32 : i32, i32
  }
}

</mosaic_0001>

<bundles_post_ra>
// kernel: tpu_custom_call.1
= control target key start
LH: loop header
LB: loop body
LE: loop exit
PB: predicated region body
PF: predicated region fallthrough
CT: control target
= control target key end

     0   :  { %v21_v0 = vlaneseq  ;;  %vm15_vm0 = vcmask 7168   ;;  %v110_v1 = vmov -inf   ;;  %vm30_vm1 = vcmask 261120   ;;  %s152_s0 = inlined_call_operand.vmem [shape: f32[8,32], index: 0, kind: input, shape index: {}]   ;;  %s153_s1 = inlined_call_operand.vmem [shape: s32[8,1], index: 1, kind: input, shape index: {}]   ;;  %s154_s2 = inlined_call_operand.vmem [shape: f32[8,1], index: 2, kind: output, shape index: {}]  }
   0x1   :  { %16 = vst.msk [vmem:[#allocation2] sm:$0xff] %vm15_vm0, %v110_v1  ;;  %v20_v2 = vld [vmem:[%s152_s0] sm:$0xff]  ;;  %v111_v6 = vmov 0   ;;  %v112_v7 = vmov 0.0  }
   0x2   :  { %v22_v3 = vand.u32 127, %v21_v0  ;;  %102 = vset.pattern.permute.xlu0 %v111_v6  ;;  %103 = vset.pattern.permute.xlu1 %v111_v6  ;;  %17 = vst.msk [vmem:[#allocation3] sm:$0xff] %vm15_vm0, %v112_v7  ;;  %v62_v8 = vld [vmem:[%s153_s1] sm:$0xff] }
   0x3   :  { %18 = vst.msk [vmem:[#allocation4] sm:$0xff] %vm15_vm0, %v112_v7  ;;  %64 = vperm.xlu1 %103, %v62_v8  }
   0x4   :  { %vm26_vm2 = vcmp.lt.s32.totalorder %v22_v3, 32  ;;  %19 = vst.msk [vmem:[#allocation5] sm:$0xff] %vm15_vm0, %v112_v7 }
   0x5   :  { %v27_v4 = vsel %vm26_vm2, %v20_v2, -inf  ;;  %v28_v16 = vsel %vm26_vm2, %v20_v2, 0.0 }
   0x6   :  { %v31_v5 = vsel %vm30_vm1, %v27_v4, -inf  ;;  %v56_v17 = vsel %vm30_vm1, %v28_v16, 0.0 }
   0x7   :  { %32 = vmax.xlane.f32.xlu0 %v31_v5 }
   0x8   :  { %v29_v9 = vld [vmem:[#allocation2] sm:$0xff] }
   0x9   :  { %v38_v31 = vld [vmem:[#allocation3] sm:$0xff] }
   0xa   :  { %v55_v26 = vld [vmem:[#allocation4] sm:$0xff] }
   0xb   :  { %v61_v23 = vld [vmem:[#allocation5] sm:$0xff] }
  0x75   :  { %v65_v13 = vpop.permute.xlu1 %64 }
  0x76   :  { %vm66_vm3 = vcmp.eq.s32.totalorder %v22_v3, %v65_v13 }
  0x77   :  { %v67_v14 = vsel %vm66_vm3, %v20_v2, 0.0 }
  0x78   :  { %v68_v15 = vsel %vm30_vm1, %v67_v14, 0.0 }
  0x79   :  { %69 = vadd.xlane.f32.xlu2 %v68_v15 }
  0x7a   :  { %v33_v10 = vpop.xlane.xlu0 %32 }
  0x7b   :  { %v34_v11 = vmax.f32 %v29_v9, %v33_v10 }
  0x7d   :  { %v35_v12 = vsub.f32 %v29_v9, %v34_v11  ;;  %54 = vst.msk [vmem:[#allocation2] sm:$0xff] %vm15_vm0, %v34_v11  ;;  %42 = vperm.xlu0 %102, %v34_v11  }
  0x7f   :  { %v36_v29 = vmul.f32 1.442695, %v35_v12 }
  0x81   :  { %57 = vadd.xlane.f32.xlu2 %v56_v17 }
  0x84   :  { %v76_v40 = vld [vmem:[#allocation2] sm:$0xff] }
  0xec   :  { %v70_v24 = vpop.xlane.xlu2 %69 }
  0xed   :  { %v71_v25 = vadd.f32 %v70_v24, %v61_v23 }
  0xef   :  { %v43_v18 = vpop.permute.xlu0 %42  ;;  %72 = vst.msk [vmem:[#allocation5] sm:$0xff] %vm15_vm0, %v71_v25 }
  0xf0   :  { %v45_v19 = vsub.f32 %v27_v4, %v43_v18 }
  0xf2   :  { %v46_v20 = vmul.f32 1.442695, %v45_v19 }
  0xf4   :  { %104 = vpow2.f32 %v46_v20  ;;  %v58_v27 = vpop.xlane.xlu2 %57 }
  0xf5   :  { %v59_v28 = vadd.f32 %v58_v27, %v55_v26  ;;  %106 = vpow2.f32 %v36_v29 }
  0xf6   :  { %v81_v37 = vld [vmem:[#allocation5] sm:$0xff] }
  0xf7   :  { %60 = vst.msk [vmem:[#allocation4] sm:$0xff] %vm15_vm0, %v59_v28  ;;  %v82_v42 = vmul.f32 0.9, %v81_v37 }
  0xfa   :  { %v105_v21 = vpop.eup %104 }
  0xfb   :  { %v48_v22 = vsel %vm30_vm1, %v105_v21, 0.0  ;;  %v107_v30 = vpop.eup %106 }
  0xfc   :  { %49 = vadd.xlane.f32.xlu1 %v48_v22  ;;  %v39_v32 = vmul.f32 %v107_v30, %v38_v31 }
  0xfe   :  { %v84_v38 = vld [vmem:[#allocation4] sm:$0xff] }
  0xff   :  { %v85_v43 = vmul.f32 0.003125, %v84_v38 }
 0x16f   :  { %v50_v33 = vpop.xlane.xlu1 %49 }
 0x170   :  { %v51_v34 = vadd.f32 %v50_v33, %v39_v32 }
 0x172   :  { %53 = vst.msk [vmem:[#allocation3] sm:$0xff] %vm15_vm0, %v51_v34 }
 0x179   :  { %v77_v35 = vld [vmem:[#allocation3] sm:$0xff] }
 0x17a   :  { %108 = vlog2.f32 %v77_v35 }
 0x180   :  { %v109_v36 = vpop.eup %108 }
 0x181   :  { %v79_v39 = vmul.f32 0.6931472, %v109_v36 }
 0x183   :  { %v80_v41 = vadd.f32 %v79_v39, %v76_v40 }
 0x185   :  { %v83_v44 = vsub.f32 %v80_v41, %v82_v42 }
 0x187   :  { %v86_v45 = vsub.f32 %v83_v44, %v85_v43 }
 0x189   :  { %94 = vst.msk [vmem:[%s154_s2] sm:$0xff] %vm15_vm0, %v86_v45 }

</bundles_post_ra>
